<compile_context>
chip_gen: v7x
topology: tpu7x:2x2x1
jax: 0.10.0
libtpu: 0.0.40
codegen_flags: <defaults>
</compile_context>

<pallas_src>
import functools

import jax
import jax.numpy as jnp
from jax.experimental import pallas as pl
from jax.experimental.pallas import tpu as pltpu

EPS = 1e-5       # eps inside calc_mean_std
BN_EPS = 1e-5    # BatchNorm2d eps


# ----------------------------------------------------------------------------
# Kernels
# ----------------------------------------------------------------------------
def _fused_kernel(training, x_ref, sm_ref, ss_ref, w_ref, b_ref, rm_ref, rv_ref,
                  o_ref):
    """VMEM-resident fast path. x_ref/o_ref: (B, C, HW); params: (C, 1)."""
    x = x_ref[...].astype(jnp.float32)                      # (B, C, HW)
    hw = x.shape[-1]
    s = jnp.sum(x, axis=-1, keepdims=True)                  # (B, C, 1)
    ss = jnp.sum(x * x, axis=-1, keepdims=True)             # (B, C, 1)
    mean = s * (1.0 / hw)
    # Unbiased spatial variance (torch .var(dim=2) default), clamped at 0.
    # TODO(synk): single-pass sum/sumsq can lose precision when |mean| >> std;
    # a two-pass variance is cheap here since x is already resident.
    var = jnp.maximum(ss - s * mean, 0.0) * (1.0 / (hw - 1)) + EPS
    std = jnp.sqrt(var)

    g = mean * sm_ref[...][None] + std * ss_ref[...][None]  # (B, C, 1)
    if training:
        mu = jnp.mean(g, axis=0, keepdims=True)             # (1, C, 1) batch stats
        v = jnp.mean((g - mu) ** 2, axis=0, keepdims=True)  # biased, as BN uses
    else:
        mu = rm_ref[...][None]
        v = rv_ref[...][None]
    z = (g - mu) * jax.lax.rsqrt(v + BN_EPS) * w_ref[...][None] + b_ref[...][None]
    gate = 1.0 / (1.0 + jnp.exp(-z))                        # sigmoid
    o_ref[...] = (x * gate).astype(o_ref.dtype)


def _stats_kernel(hw_total, x_ref, stat_ref):
    """Per-row sum/sumsq accumulated over HW chunks in the resident output
    block; finalized to (mean, std) on the last chunk.
    x_ref: (TM, THW); stat_ref: (TM, 2) f32 (lane 0 = mean, lane 1 = std)."""
    j = pl.program_id(1)

    @pl.when(j == 0)
    def _():
        stat_ref[...] = jnp.zeros_like(stat_ref)

    x = x_ref[...].astype(jnp.float32)
    # TODO(synk): for bf16 on v7x, offload the plain row-sum to the idle MXU
    # (dot with a ones matrix) to keep this pass HBM-bound instead of VPU-bound.
    s = jnp.sum(x, axis=-1, keepdims=True)                  # (TM, 1)
    ss = jnp.sum(x * x, axis=-1, keepdims=True)             # (TM, 1)
    stat_ref[...] += jnp.concatenate([s, ss], axis=-1)

    @pl.when(j == pl.num_programs(1) - 1)
    def _():
        s_tot = stat_ref[:, 0:1]
        ss_tot = stat_ref[:, 1:2]
        mean = s_tot * (1.0 / hw_total)
        var = jnp.maximum(ss_tot - s_tot * mean, 0.0) * (1.0 / (hw_total - 1)) + EPS
        stat_ref[...] = jnp.concatenate([mean, jnp.sqrt(var)], axis=-1)


def _apply_kernel(x_ref, gate_ref, o_ref):
    """out = x * gate (gate broadcast along lanes), computed in the I/O dtype."""
    o_ref[...] = (x_ref[...] * gate_ref[...]).astype(o_ref.dtype)


# ----------------------------------------------------------------------------
# Tiling helpers
# ----------------------------------------------------------------------------
def _default_vmem_limit_bytes():
    """3/4 of physical per-core VMEM: 48 MiB on v7x, 96 MiB on v5e/v6e."""
    try:
        cap = int(pltpu.get_tpu_info().vmem_capacity_bytes)
    except Exception:
        cap = 64 << 20      # conservative fallback = v7x per-TensorCore VMEM
    return min((cap * 3) // 4, 96 << 20)


def _pick_tiles(bc, hw, itemsize, budget_bytes, sub):
    """Pick (tm, thw): row tile (multiple of `sub`, divides bc) and spatial tile
    (multiple of 128, divides hw) with tm*thw*itemsize <= budget_bytes.
    Prefers the widest spatial tile, then an even (>=2) number of row grid
    steps so v7x's two TensorCores split the 'parallel' axis evenly."""
    thw_cands = [t for t in range(128, hw + 1, 128)
                 if hw % t == 0 and sub * t * itemsize <= budget_bytes]
    thw = max(thw_cands) if thw_cands else 128

    tm_cands = [r for r in range(sub, bc + 1, sub)
                if bc % r == 0 and r * thw * itemsize <= budget_bytes]
    if not tm_cands:
        tm_cands = [sub]
    even = [r for r in tm_cands if (bc // r) % 2 == 0]
    tm = max(even) if even else max(tm_cands)
    return tm, thw


# ----------------------------------------------------------------------------
# Wrapper (forward pass of BNStyleAttentionLayer)
# ----------------------------------------------------------------------------
def bn_style_attention_layer(x, scale_mean, scale_std, bn_weight, bn_bias,
                             bn_running_mean=None, bn_running_var=None,
                             *, training=True, vmem_limit_bytes=None,
                             force_two_pass=False):
    """x: (B, C, H, W) f32/bf16; per-channel params: (C,). Returns same shape/dtype."""
    B, C, H, W = x.shape
    BC, HW = B * C, H * W
    itemsize = x.dtype.itemsize
    vmem_limit = int(vmem_limit_bytes) if vmem_limit_bytes else _default_vmem_limit_bytes()

    # TODO(synk): BatchNorm running-stat momentum updates (stateful training-time
    # side effect) are not reproduced; only the forward output is computed.

    # ---- Fused fast path: whole activation resident in VMEM ----------------
    # Budget accounting per element: in + out (2*itemsize) + f32 widened copy +
    # one f32 temporary (+ slack) ~= 2*itemsize + 12 bytes.
    if (not force_two_pass) and BC * HW * (2 * itemsize + 12) <= vmem_limit:
        x3 = x.reshape(B, C, HW)
        col = lambda p: jnp.asarray(p, jnp.float32).reshape(C, 1)
        rm = (col(bn_running_mean) if bn_running_mean is not None
              else jnp.zeros((C, 1), jnp.float32))
        rv = (col(bn_running_var) if bn_running_var is not None
              else jnp.ones((C, 1), jnp.float32))
        out3 = pl.pallas_call(
            functools.partial(_fused_kernel, training),
            out_shape=jax.ShapeDtypeStruct((B, C, HW), x.dtype),
            compiler_params=pltpu.CompilerParams(vmem_limit_bytes=vmem_limit),
        )(x3, col(scale_mean), col(scale_std), col(bn_weight), col(bn_bias), rm, rv)
        return out3.reshape(B, C, H, W)

    # ---- Two-pass tiled path -----------------------------------------------
    sub = max(8, 32 // itemsize)          # sublane multiple: f32->8, bf16->16, int8->32
    assert BC % sub == 0, "B*C must be a multiple of the dtype sublane packing"
    assert HW % 128 == 0, "H*W must be a multiple of 128 (lane tiling)"
    # TODO(synk): pad / mask ragged tails instead of asserting for odd shapes.

    x2 = x.reshape(BC, HW)                # free reshape in HBM

    # Stats pass double-buffers one big operand (~2x block); apply pass
    # double-buffers in + out (~4x block). Leave headroom for compiler scratch.
    tm_s, thw_s = _pick_tiles(BC, HW, itemsize, vmem_limit // 3, sub)
    tm_a, thw_a = _pick_tiles(BC, HW, itemsize, vmem_limit // 5, sub)

    # ---- Pass 1: per-(b, c) spatial statistics (single pass over x) --------
    stat = pl.pallas_call(
        functools.partial(_stats_kernel, HW),
        out_shape=jax.ShapeDtypeStruct((BC, 2), jnp.float32),
        grid_spec=pltpu.PrefetchScalarGridSpec(
            num_scalar_prefetch=0,
            grid=(BC // tm_s, HW // thw_s),          # reduction axis last
            in_specs=[pl.BlockSpec((tm_s, thw_s), lambda i, j: (i, j))],
            out_specs=pl.BlockSpec((tm_s, 2), lambda i, j: (i, 0))),
        compiler_params=pltpu.CompilerParams(
            dimension_semantics=("parallel", "arbitrary"),
            vmem_limit_bytes=vmem_limit),
    )(x2)

    # ---- Tiny (B, C) gate math: affine + BatchNorm2d + sigmoid -------------
    # BN couples rows across the batch and only touches B*C scalars; it stays
    # in plain JAX between the two bandwidth-bound kernels.
    mean_bc = stat[:, 0].reshape(B, C)
    std_bc = stat[:, 1].reshape(B, C)
    g = mean_bc * scale_mean[None, :] + std_bc * scale_std[None, :]      # (B, C)
    if training:
        mu = jnp.mean(g, axis=0)                                         # (C,)
        var = jnp.mean((g - mu[None, :]) ** 2, axis=0)                   # biased (BN)
    else:
        mu = (bn_running_mean if bn_running_mean is not None
              else jnp.zeros((C,), jnp.float32))
        var = (bn_running_var if bn_running_var is not None
               else jnp.ones((C,), jnp.float32))
    g_hat = (g - mu[None, :]) * jax.lax.rsqrt(var[None, :] + BN_EPS)
    gate = jax.nn.sigmoid(g_hat * bn_weight[None, :] + bn_bias[None, :])
    gate2 = gate.reshape(BC, 1).astype(x.dtype)   # multiply in the I/O dtype

    # ---- Pass 2: out = x * gate --------------------------------------------
    out2 = pl.pallas_call(
        _apply_kernel,
        out_shape=jax.ShapeDtypeStruct((BC, HW), x.dtype),
        grid_spec=pltpu.PrefetchScalarGridSpec(
            num_scalar_prefetch=0,
            grid=(BC // tm_a, HW // thw_a),
            in_specs=[pl.BlockSpec((tm_a, thw_a), lambda i, j: (i, j)),
                      pl.BlockSpec((tm_a, 1), lambda i, j: (i, 0))],
            out_specs=pl.BlockSpec((tm_a, thw_a), lambda i, j: (i, j))),
        compiler_params=pltpu.CompilerParams(
            dimension_semantics=("parallel", "parallel"),
            vmem_limit_bytes=vmem_limit),
    )(x2, gate2)

    return out2.reshape(B, C, H, W)


# ----------------------------------------------------------------------------
# Pure-JAX reference mirroring the PyTorch forward (training-mode BN)
# ----------------------------------------------------------------------------
def bn_style_attention_ref(x, scale_mean, scale_std, bn_weight, bn_bias):
    B, C, H, W = x.shape
    flat = x.reshape(B, C, -1).astype(jnp.float32)
    mean = flat.mean(axis=2)                                    # (B, C)
    var = flat.var(axis=2, ddof=1) + EPS                        # unbiased
    std = jnp.sqrt(var)
    g = mean * scale_mean[None, :] + std * scale_std[None, :]   # (B, C)
    mu = g.mean(axis=0)
    v = g.var(axis=0)                                           # biased (BN batch stats)
    g_hat = (g - mu[None, :]) / jnp.sqrt(v[None, :] + BN_EPS)
    gate = jax.nn.sigmoid(g_hat * bn_weight[None, :] + bn_bias[None, :])
    return (x.astype(jnp.float32) * gate[:, :, None, None]).astype(x.dtype)


if __name__ == "__main__":
    key = jax.random.PRNGKey(0)
    kx, k1, k2, k3, k4 = jax.random.split(key, 5)

    # Module init fills scale_mean/scale_std with 0 and BN with weight=1, bias=0.
    # Small deterministic perturbations so every term is actually exercised.
    B, C, H, W = 2, 4, 16, 16
    x = jax.random.normal(kx, (B, C, H, W), dtype=jnp.float32)
    scale_mean = 0.1 * jax.random.normal(k1, (C,), dtype=jnp.float32)
    scale_std = 0.1 * jax.random.normal(k2, (C,), dtype=jnp.float32)
    bn_weight = 1.0 + 0.1 * jax.random.normal(k3, (C,), dtype=jnp.float32)
    bn_bias = 0.1 * jax.random.normal(k4, (C,), dtype=jnp.float32)

    ref = bn_style_attention_ref(x, scale_mean, scale_std, bn_weight, bn_bias)

    # 1) Fused VMEM-resident fast path (default dispatch at this size).
    out_fused = jax.block_until_ready(
        bn_style_attention_layer(x, scale_mean, scale_std, bn_weight, bn_bias))
    assert out_fused.shape == x.shape and out_fused.dtype == x.dtype
    assert jnp.allclose(out_fused, ref, atol=1e-4, rtol=1e-5), "fused path mismatch"

    # 2) Two-pass tiled path (forced at small shape for coverage).
    out_tiled = jax.block_until_ready(
        bn_style_attention_layer(x, scale_mean, scale_std, bn_weight, bn_bias,
                                 force_two_pass=True))
    assert jnp.allclose(out_tiled, ref, atol=1e-4, rtol=1e-5), "tiled path mismatch"

    # 3) bf16 coverage of the tiled path (dtype-aware sublane tiling, dtype-native apply).
    Bb, Cb, Hb, Wb = 4, 8, 32, 32
    xb = jax.random.normal(kx, (Bb, Cb, Hb, Wb), dtype=jnp.bfloat16)
    smb = 0.1 * jax.random.normal(k1, (Cb,), dtype=jnp.float32)
    ssb = 0.1 * jax.random.normal(k2, (Cb,), dtype=jnp.float32)
    wb = 1.0 + 0.1 * jax.random.normal(k3, (Cb,), dtype=jnp.float32)
    bb = 0.1 * jax.random.normal(k4, (Cb,), dtype=jnp.float32)
    out_b = jax.block_until_ready(
        bn_style_attention_layer(xb, smb, ssb, wb, bb, force_two_pass=True))
    ref_b = bn_style_attention_ref(xb, smb, ssb, wb, bb)
    assert jnp.allclose(out_b.astype(jnp.float32), ref_b.astype(jnp.float32),
                        atol=5e-2, rtol=5e-2), "bf16 tiled path mismatch"

    print("KERNEL_OK")
</pallas_src>

<mosaic_0001>
module attributes {stable_mosaic.version = 11 : i64} {
  func.func @_fused_kernel(%arg0: memref<2x4x256xf32, #tpu.memory_space<vmem>>, %arg1: memref<4x1xf32, #tpu.memory_space<vmem>>, %arg2: memref<4x1xf32, #tpu.memory_space<vmem>>, %arg3: memref<4x1xf32, #tpu.memory_space<vmem>>, %arg4: memref<4x1xf32, #tpu.memory_space<vmem>>, %arg5: memref<4x1xf32, #tpu.memory_space<vmem>>, %arg6: memref<4x1xf32, #tpu.memory_space<vmem>>, %arg7: memref<2x4x256xf32, #tpu.memory_space<vmem>>) attributes {dimension_semantics = [], scalar_prefetch = 0 : i64, scratch_operands = 0 : i64, tpu.core_type = #tpu.core_type<tc>} {
    %c0 = arith.constant 0 : index
    %c0_0 = arith.constant 0 : index
    %c0_1 = arith.constant 0 : index
    %0 = vector.load %arg0[%c0, %c0_0, %c0_1] : memref<2x4x256xf32, #tpu.memory_space<vmem>>, vector<2x4x256xf32>
    %cst = arith.constant dense<0.000000e+00> : vector<2x4xf32>
    %1 = vector.multi_reduction <add>, %0, %cst [2] : vector<2x4x256xf32> to vector<2x4xf32>
    %2 = vector.shape_cast %1 : vector<2x4xf32> to vector<2x4x1xf32>
    %3 = arith.mulf %0, %0 : vector<2x4x256xf32>
    %cst_2 = arith.constant dense<0.000000e+00> : vector<2x4xf32>
    %4 = vector.multi_reduction <add>, %3, %cst_2 [2] : vector<2x4x256xf32> to vector<2x4xf32>
    %5 = vector.shape_cast %4 : vector<2x4xf32> to vector<2x4x1xf32>
    %cst_3 = arith.constant 3.906250e-03 : f32
    %6 = vector.broadcast %cst_3 : f32 to vector<2x4x1xf32>
    %7 = arith.mulf %2, %6 : vector<2x4x1xf32>
    %8 = arith.mulf %2, %7 : vector<2x4x1xf32>
    %9 = arith.subf %5, %8 : vector<2x4x1xf32>
    %cst_4 = arith.constant 0.000000e+00 : f32
    %10 = vector.broadcast %cst_4 : f32 to vector<2x4x1xf32>
    %11 = arith.maximumf %9, %10 : vector<2x4x1xf32>
    %cst_5 = arith.constant 0.00392156886 : f32
    %12 = vector.broadcast %cst_5 : f32 to vector<2x4x1xf32>
    %13 = arith.mulf %11, %12 : vector<2x4x1xf32>
    %cst_6 = arith.constant 9.99999974E-6 : f32
    %14 = vector.broadcast %cst_6 : f32 to vector<2x4x1xf32>
    %15 = arith.addf %13, %14 : vector<2x4x1xf32>
    %16 = math.sqrt %15 : vector<2x4x1xf32>
    %c0_7 = arith.constant 0 : index
    %c0_8 = arith.constant 0 : index
    %17 = vector.load %arg1[%c0_7, %c0_8] : memref<4x1xf32, #tpu.memory_space<vmem>>, vector<4x1xf32>
    %18 = vector.shape_cast %17 : vector<4x1xf32> to vector<1x4x1xf32>
    %19 = vector.broadcast %18 : vector<1x4x1xf32> to vector<2x4x1xf32>
    %20 = arith.mulf %7, %19 : vector<2x4x1xf32>
    %c0_9 = arith.constant 0 : index
    %c0_10 = arith.constant 0 : index
    %21 = vector.load %arg2[%c0_9, %c0_10] : memref<4x1xf32, #tpu.memory_space<vmem>>, vector<4x1xf32>
    %22 = vector.shape_cast %21 : vector<4x1xf32> to vector<1x4x1xf32>
    %23 = vector.broadcast %22 : vector<1x4x1xf32> to vector<2x4x1xf32>
    %24 = arith.mulf %16, %23 : vector<2x4x1xf32>
    %25 = arith.addf %20, %24 : vector<2x4x1xf32>
    %cst_11 = arith.constant dense<0.000000e+00> : vector<4x1xf32>
    %26 = vector.multi_reduction <add>, %25, %cst_11 [0] : vector<2x4x1xf32> to vector<4x1xf32>
    %27 = vector.shape_cast %26 : vector<4x1xf32> to vector<1x4x1xf32>
    %cst_12 = arith.constant 2.000000e+00 : f32
    %28 = vector.broadcast %cst_12 : f32 to vector<1x4x1xf32>
    %29 = arith.divf %27, %28 : vector<1x4x1xf32>
    %30 = vector.broadcast %29 : vector<1x4x1xf32> to vector<2x4x1xf32>
    %31 = arith.subf %25, %30 : vector<2x4x1xf32>
    %32 = arith.mulf %31, %31 : vector<2x4x1xf32>
    %cst_13 = arith.constant dense<0.000000e+00> : vector<4x1xf32>
    %33 = vector.multi_reduction <add>, %32, %cst_13 [0] : vector<2x4x1xf32> to vector<4x1xf32>
    %34 = vector.shape_cast %33 : vector<4x1xf32> to vector<1x4x1xf32>
    %cst_14 = arith.constant 2.000000e+00 : f32
    %35 = vector.broadcast %cst_14 : f32 to vector<1x4x1xf32>
    %36 = arith.divf %34, %35 : vector<1x4x1xf32>
    %37 = vector.broadcast %29 : vector<1x4x1xf32> to vector<2x4x1xf32>
    %38 = arith.subf %25, %37 : vector<2x4x1xf32>
    %cst_15 = arith.constant 9.99999974E-6 : f32
    %39 = vector.broadcast %cst_15 : f32 to vector<1x4x1xf32>
    %40 = arith.addf %36, %39 : vector<1x4x1xf32>
    %41 = math.rsqrt %40 : vector<1x4x1xf32>
    %42 = vector.broadcast %41 : vector<1x4x1xf32> to vector<2x4x1xf32>
    %43 = arith.mulf %38, %42 : vector<2x4x1xf32>
    %c0_16 = arith.constant 0 : index
    %c0_17 = arith.constant 0 : index
    %44 = vector.load %arg3[%c0_16, %c0_17] : memref<4x1xf32, #tpu.memory_space<vmem>>, vector<4x1xf32>
    %45 = vector.shape_cast %44 : vector<4x1xf32> to vector<1x4x1xf32>
    %46 = vector.broadcast %45 : vector<1x4x1xf32> to vector<2x4x1xf32>
    %47 = arith.mulf %43, %46 : vector<2x4x1xf32>
    %c0_18 = arith.constant 0 : index
    %c0_19 = arith.constant 0 : index
    %48 = vector.load %arg4[%c0_18, %c0_19] : memref<4x1xf32, #tpu.memory_space<vmem>>, vector<4x1xf32>
    %49 = vector.shape_cast %48 : vector<4x1xf32> to vector<1x4x1xf32>
    %50 = vector.broadcast %49 : vector<1x4x1xf32> to vector<2x4x1xf32>
    %51 = arith.addf %47, %50 : vector<2x4x1xf32>
    %cst_20 = arith.constant 0.000000e+00 : f32
    %52 = vector.broadcast %cst_20 : f32 to vector<2x4x1xf32>
    %53 = arith.subf %52, %51 : vector<2x4x1xf32>
    %54 = math.exp %53 : vector<2x4x1xf32>
    %cst_21 = arith.constant 1.000000e+00 : f32
    %55 = vector.broadcast %cst_21 : f32 to vector<2x4x1xf32>
    %56 = arith.addf %55, %54 : vector<2x4x1xf32>
    %cst_22 = arith.constant 1.000000e+00 : f32
    %57 = vector.broadcast %cst_22 : f32 to vector<2x4x1xf32>
    %58 = arith.divf %57, %56 : vector<2x4x1xf32>
    %59 = vector.broadcast %58 : vector<2x4x1xf32> to vector<2x4x256xf32>
    %60 = arith.mulf %0, %59 : vector<2x4x256xf32>
    %c0_23 = arith.constant 0 : index
    %c0_24 = arith.constant 0 : index
    %c0_25 = arith.constant 0 : index
    %61 = vector.load %arg7[%c0_23, %c0_24, %c0_25] : memref<2x4x256xf32, #tpu.memory_space<vmem>>, vector<2x4x256xf32>
    tpu.vector_store %arg7[%c0_23, %c0_24, %c0_25], %60 {strides = array<i32>} : memref<2x4x256xf32, #tpu.memory_space<vmem>>, vector<2x4x256xf32>,
    return
  }
}

</mosaic_0001>

<bundles_post_ra>
// kernel: tpu_custom_call.1
= control target key start
LH: loop header
LB: loop body
LE: loop exit
PB: predicated region body
PF: predicated region fallthrough
CT: control target
= control target key end

     0   :  { %vm35_vm0 = vcmask 1043456   ;;  %s324_s0 = inlined_call_operand.vmem [shape: f32[2,4,256], index: 0, kind: input, shape index: {}]   ;;  %s325_s1 = inlined_call_operand.vmem [shape: f32[4,1], index: 1, kind: input, shape index: {}]   ;;  %s326_s2 = inlined_call_operand.vmem [shape: f32[4,1], index: 2, kind: input, shape index: {}]   ;;  %s327_s3 = inlined_call_operand.vmem [shape: f32[4,1], index: 3, kind: input, shape index: {}]   ;;  %s328_s4 = inlined_call_operand.vmem [shape: f32[4,1], index: 4, kind: input, shape index: {}]   ;;  %s329_s5 = inlined_call_operand.vmem [shape: f32[4,1], index: 5, kind: input, shape index: {}]   ;;  %s330_s6 = inlined_call_operand.vmem [shape: f32[4,1], index: 6, kind: input, shape index: {}]   ;;  %s331_s7 = inlined_call_operand.hbm [shape: f32[2,4,256], index: 7, kind: output, shape index: {}]  }
   0x1   :  { %v273_v0 = vld [vmem:[%s324_s0] sm:$0xff]  ;;  %v278_v1 = vld [vmem:[%s324_s0 + $0x8] sm:$0xff] }
   0x2   :  { %v31_v2 = vcombine.high %v273_v0, %v273_v0  ;;  %v36_v3 = vsel %vm35_vm0, %v273_v0, 0.0  ;;  %v46_v4 = vmul.f32 %v273_v0, %v273_v0  ;;  %v32_v5 = vcombine.high %v278_v1, %v278_v1 }
   0x3   :  { %12 = vsyncpa [#allocation3], 0  ;;  %v41_v6 = vsel %vm35_vm0, %v278_v1, 0.0  ;;  %v47_v7 = vmul.f32 %v278_v1, %v278_v1  ;;  %v225_v20 = vmov 0   ;;  %v93_v40 = vld [vmem:[%s326_s2] sm:$0xf] }
   0x4   :  { %v37_v8 = vsel %vm35_vm0, %v31_v2, 0.0  ;;  %v50_v9 = vcombine.high %v46_v4, %v46_v4  ;;  %v54_v10 = vsel %vm35_vm0, %v46_v4, 0.0  ;;  %v42_v11 = vsel %vm35_vm0, %v32_v5, 0.0  ;;  %184 = vset.pattern.permute.xlu1 %v225_v20  ;;  %183 = vset.pattern.permute.xlu0 %v225_v20  ;;  %v90_v44 = vld [vmem:[%s325_s1] sm:$0xf] }
   0x5   :  { %v38_v12 = vadd.f32 %v37_v8, %v36_v3  ;;  %v51_v13 = vcombine.high %v47_v7, %v47_v7  ;;  %v59_v15 = vsel %vm35_vm0, %v47_v7, 0.0  ;;  %v43_v17 = vadd.f32 %v42_v11, %v41_v6  ;;  %v116_v7 = vld [vmem:[%s327_s3] sm:$0xf]  ;;  %s227_s3 = smov [#allocation2]  }
   0x6   :  { %v55_v14 = vsel %vm35_vm0, %v50_v9, 0.0  ;;  %vm98_vm5 = vcmask 3072  }
   0x7   :  { %39 = vadd.xlane.f32.xlu0 %v38_v12  ;;  %v56_v16 = vadd.f32 %v55_v14, %v54_v10  ;;  %v60_v18 = vsel %vm35_vm0, %v51_v13, 0.0  ;;  %v119_v10 = vld [vmem:[%s328_s4] sm:$0xf]  ;;  %s167_s4 = sshll.u32 %s227_s3, 4  ;;  %s168_s4 = int_to_ptr.vmem [resolvable:$true] %s167_s4 }
   0x8   :  { %v61_v19 = vadd.f32 %v60_v18, %v59_v15  ;;  %s201_s8 = scalar_lea.vmem %s168_s4, 256  ;;  %p206_p1 = scmp.lt.s32.totalorder %s168_s4, %s168_s4 }
   0x9   :  { %57 = vadd.xlane.f32.xlu1 %v56_v16  ;;  %p202_p0 = scmp.ne.s32.totalorder %s168_s4, %s201_s8  ;;  %p207_p2 = scmp.lt.s32.totalorder %s201_s8, %s201_s8 }
   0xb   :  { %44 = vadd.xlane.f32.xlu0 %v43_v17  ;;  %p208_p3 = por %p207_p2, %p206_p1 }
   0xd   :  { %62 = vadd.xlane.f32.xlu1 %v61_v19  ;;  %p209_p4 = pnand %p208_p3, %p202_p0 }
  0x94   :  { %v40_v21 = vpop.xlane.xlu0 %39 }
  0x95   :  { %v64_v22 = vmul.f32 0.00390625, %v40_v21 }
  0x96   :  { %v58_v23 = vpop.xlane.xlu1 %57 }
  0x97   :  { %v66_v24 = vmul.f32 %v64_v22, %v40_v21  ;;  %v91_v48 = vmul.f32 %v90_v44, %v64_v22 }
  0x98   :  { %v45_v25 = vpop.xlane.xlu0 %44 }
  0x99   :  { %v68_v26 = vsub.f32 %v58_v23, %v66_v24  ;;  %v65_v27 = vmul.f32 0.00390625, %v45_v25 }
  0x9a   :  { %v63_v28 = vpop.xlane.xlu1 %62 }
  0x9b   :  { %v70_v29 = vmax.f32 %v68_v26, 0.0  ;;  %v67_v30 = vmul.f32 %v65_v27, %v45_v25  ;;  %v92_v52 = vmul.f32 %v90_v44, %v65_v27  ;;  %v226_v25 = vmov 839922192  }
  0x9c   :  { %v143_v26 = vunpack.c.l.s4 %v226_v25  ;;  %v145_v27 = vlaneseq }
  0x9d   :  { %v72_v31 = vmul.f32 0.003921569, %v70_v29  ;;  %v69_v32 = vsub.f32 %v63_v28, %v67_v30 }
  0x9e   :  { %v144_v28 = vunpack.c.0.s8 %v143_v26  ;;  %v146_v29 = vshrl.u32 %v145_v27, 7 }
  0x9f   :  { %v74_v33 = vadd.f32 1e-05, %v72_v31  ;;  %v71_v34 = vmax.f32 %v69_v32, 0.0 }
  0xa0   :  { %v147_v30 = vsub.s32 %v144_v28, %v146_v29 }
  0xa1   :  { %187 = vrsqrt.f32 %v74_v33  ;;  %v73_v35 = vmul.f32 0.003921569, %v71_v34  ;;  %vm78_vm1 = vcmp.eq.f32.partialorder %v74_v33, inf  ;;  %v81_v39 = vand.u32 2147483648, %v74_v33 }
  0xa2   :  { %vm80_vm2 = vcmp.eq.f32.partialorder %v74_v33, 0.0 }
  0xa3   :  { %v75_v36 = vadd.f32 1e-05, %v73_v35 }
  0xa5   :  { %189 = vrsqrt.f32 %v75_v36  ;;  %vm85_vm3 = vcmp.eq.f32.partialorder %v75_v36, inf  ;;  %v88_v47 = vand.u32 2147483648, %v75_v36  ;;  %vm87_vm4 = vcmp.eq.f32.partialorder %v75_v36, 0.0 }
  0xab   :  { %v188_v37 = vpop.eup %187 }
  0xac   :  { %v77_v38 = vmul.f32 %v188_v37, %v74_v33 }
  0xae   :  { %v79_v41 = vsel %vm78_vm1, %v74_v33, %v77_v38 }
  0xaf   :  { %v82_v42 = vsel %vm80_vm2, %v81_v39, %v79_v41  ;;  %v190_v43 = vpop.eup %189 }
  0xb0   :  { %v94_v45 = vmul.f32 %v93_v40, %v82_v42  ;;  %v84_v46 = vmul.f32 %v190_v43, %v75_v36 }
  0xb2   :  { %v86_v49 = vsel %vm85_vm3, %v75_v36, %v84_v46  ;;  %v96_v51 = vadd.f32 %v94_v45, %v91_v48 }
  0xb3   :  { %v89_v50 = vsel %vm87_vm4, %v88_v47, %v86_v49 }
  0xb4   :  { %v95_v53 = vmul.f32 %v93_v40, %v89_v50  ;;  %v99_v55 = vsel %vm98_vm5, %v96_v51, 0.0 }
  0xb6   :  { %v97_v54 = vadd.f32 %v95_v53, %v92_v52 }
  0xb8   :  { %v100_v56 = vsel %vm98_vm5, %v97_v54, 0.0 }
  0xb9   :  { %v101_v57 = vadd.f32 %v100_v56, %v99_v55 }
  0xbb   :  { %v103_v58 = vmul.f32 0.5, %v101_v57 }
  0xbd   :  { %v104_v59 = vsub.f32 %v96_v51, %v103_v58  ;;  %v105_v60 = vsub.f32 %v97_v54, %v103_v58 }
  0xbf   :  { %v106_v61 = vmul.f32 %v104_v59, %v104_v59  ;;  %v107_v62 = vmul.f32 %v105_v60, %v105_v60 }
  0xc1   :  { %v108_v63 = vsel %vm98_vm5, %v106_v61, 0.0  ;;  %v109_v2 = vsel %vm98_vm5, %v107_v62, 0.0 }
  0xc2   :  { %v110_v3 = vadd.f32 %v109_v2, %v108_v63 }
  0xc4   :  { %v111_v4 = vmul.f32 0.5, %v110_v3 }
  0xc6   :  { %v112_v5 = vadd.f32 1e-05, %v111_v4 }
  0xc8   :  { %191 = vrsqrt.f32 %v112_v5 }
  0xd2   :  { %v192_v6 = vpop.eup %191 }
  0xd3   :  { %v114_v8 = vmul.f32 %v192_v6, %v104_v59  ;;  %v115_v9 = vmul.f32 %v192_v6, %v105_v60 }
  0xd5   :  { %v118_v11 = vmul.f32 %v116_v7, %v115_v9  ;;  %v117_v12 = vmul.f32 %v116_v7, %v114_v8 }
  0xd7   :  { %v121_v13 = vadd.f32 %v119_v10, %v118_v11  ;;  %v120_v14 = vadd.f32 %v119_v10, %v117_v12 }
  0xd9   :  { %v123_v15 = vsub.f32 0.0, %v121_v13  ;;  %v122_v16 = vsub.f32 0.0, %v120_v14 }
  0xdb   :  { %v126_v17 = vmul.f32 1.442695, %v123_v15  ;;  %v124_v18 = vmul.f32 1.442695, %v122_v16 }
  0xdd   :  { %193 = vpow2.f32 %v126_v17 }
  0xde   :  { %195 = vpow2.f32 %v124_v18 }
  0xe7   :  { %v194_v19 = vpop.eup %193 }
  0xe8   :  { %v196_v20 = vpop.eup %195  ;;  %v129_v21 = vadd.f32 1.0, %v194_v19 }
  0xe9   :  { %v128_v22 = vadd.f32 1.0, %v196_v20 }
  0xea   :  { %197 = vrcp.f32 %v129_v21 }
  0xeb   :  { %199 = vrcp.f32 %v128_v22 }
  0xf4   :  { %v198_v23 = vpop.eup %197 }
  0xf5   :  { %v200_v24 = vpop.eup %199  ;;  %140 = vperm.xlu1 %184, %v198_v23  }
  0xf6   :  { %136 = vperm.xlu0 %183, %v200_v24  }
 0x174   :  { %v141_v31 = vpop.permute.xlu1 %140 }
 0x175   :  { %v155_v32 = vrot.slane %v141_v31, %v147_v30  ;;  %v137_v33 = vpop.permute.xlu0 %136 }
 0x176   :  { %v148_v34 = vrot.slane %v137_v33, %v147_v30 }
 0x177   :  { %v159_v35 = vmul.f32 %v155_v32, %v278_v1 }
 0x178   :  { %v158_v36 = vmul.f32 %v148_v34, %v273_v0 }
 0x179   :  { %161 = vst [vmem:[#allocation2 + $0x8] sm:$0xff] %v159_v35 }
 0x17a   :  { %160 = vst [vmem:[#allocation2] sm:$0xff] %v158_v36 }
 0x17b   :  { %212 = shalt.err (!%p209_p4)
}
 0x17c   :  { %s213_s11 = scalar_lea.hbm %s331_s7, 256 }
 0x17d   :  { %p214_p5 = scmp.ne.s32.totalorder %s331_s7, %s213_s11  ;;  %p217_p6 = scmp.lt.u32.totalorder %s213_s11, %s331_s7 }
 0x17f   :  { %p219_p7 = pnand %p217_p6, %p214_p5 }
 0x181   :  { %222 = shalt.err (!%p219_p7)
}
 0x182   :  { %s228_s16 = smov 128   ;;  %s229_s17 = smov 8  }
 0x183   :  { %173 = dma.vmem_to_hbm [thread:$0]  %s168_s4, 256, %s331_s7, [#allocation3], %s228_s16, %s228_s16, %s229_s17  }
 0x184   :  { %223 = dma.done.wait [#allocation3], 256  }
 0x185   :  { %224 = vsyncadd [#allocation3], 4294967040 }
 0x186   :  { %177 = vsyncpa [#allocation3], 1 }

</bundles_post_ra>
